<compile_context>
chip_gen: v7x
topology: tpu7x:2x2x1
jax: 0.10.0
libtpu: 0.0.40
codegen_flags: <defaults>
</compile_context>

<pallas_src>
import functools

import jax
import jax.numpy as jnp
from jax.experimental import pallas as pl
from jax.experimental.pallas import tpu as pltpu

BN_EPS = 1e-5
LANE = 128
_VMEM_LIMIT = 48 << 20   # headroom for v7x (64 MiB physical VMEM per TC)


def _round_up(n, m):
    return (n + m - 1) // m * m


# ---------------------------------------------------------------------------
# Phase 1: h = x @ w1 + b1  and per-tile BatchNorm partial sums.
# ---------------------------------------------------------------------------
def _phase1_kernel(x_ref, w1_ref, b1_ref, h_ref, sum_ref, sq_ref, *,
                   batch, tile_b, batch_padded):
    h = jnp.dot(x_ref[...], w1_ref[...], preferred_element_type=jnp.float32)
    h = h + b1_ref[...]
    h_ref[...] = h

    if batch_padded != batch:
        # Zero padded batch rows so they do not pollute the BN statistics.
        row = (pl.program_id(0) * tile_b
               + jax.lax.broadcasted_iota(jnp.int32, (tile_b, 1), 0))
        h = jnp.where(row < batch, h, 0.0)

    # One-pass statistics: var = E[h^2] - mean^2 (halves cross-sublane reductions).
    sum_ref[...] = jnp.sum(h, axis=0, keepdims=True)
    sq_ref[...] = jnp.sum(h * h, axis=0, keepdims=True)


# ---------------------------------------------------------------------------
# Phase 2: out = relu(h * scale + shift) @ w2 + b2
# ---------------------------------------------------------------------------
def _phase2_kernel(h_ref, scale_ref, shift_ref, w2_ref, b2_ref, o_ref):
    hn = h_ref[...] * scale_ref[...] + shift_ref[...]        # f32 elementwise
    hn = jnp.maximum(hn, 0.0)
    out = jnp.dot(hn.astype(jnp.bfloat16), w2_ref[...],
                  preferred_element_type=jnp.float32)
    o_ref[...] = (out + b2_ref[...]).astype(o_ref.dtype)


def prepare_params(params):
    """Pad feature dims to lane width (128) once and cast matmul weights to bf16.

    Zero padding is exact: padded hidden features are identically 0 through
    BN+ReLU and the corresponding w2 rows are 0, so real outputs are untouched.
    """
    dim, hidden = params["w1"].shape
    proj = params["w2"].shape[1]
    hp = _round_up(hidden, LANE)
    pp = _round_up(proj, LANE)
    ph, pj = hp - hidden, pp - proj
    return {
        "w1": jnp.pad(params["w1"], ((0, 0), (0, ph))).astype(jnp.bfloat16),
        "b1": jnp.pad(params["b1"], ((0, 0), (0, ph))).astype(jnp.float32),
        "gamma": jnp.pad(params["gamma"], ((0, 0), (0, ph))).astype(jnp.float32),
        "beta": jnp.pad(params["beta"], ((0, 0), (0, ph))).astype(jnp.float32),
        "w2": jnp.pad(params["w2"], ((0, ph), (0, pj))).astype(jnp.bfloat16),
        "b2": jnp.pad(params["b2"], ((0, 0), (0, pj))).astype(jnp.float32),
        "dim": dim, "hidden": hidden, "proj": proj, "hp": hp, "pp": pp,
    }


def mlp_forward(x, p):
    """x: [B, dim] float32.  p: output of prepare_params()."""
    B, dim = x.shape
    hp, pp, proj = p["hp"], p["pp"], p["proj"]

    # Batch tiling: up to 256 rows per grid step; any batch padding is masked
    # out of the BN statistics inside the kernel.
    tb = min(256, _round_up(B, 8))
    b_pad = _round_up(B, tb)
    grid_b = b_pad // tb

    xb = x.astype(jnp.bfloat16)
    if b_pad != B:
        xb = jnp.pad(xb, ((0, b_pad - B), (0, 0)))

    def resident(shape):
        return pl.BlockSpec(shape, lambda i: (0,) * len(shape))

    # ---- Phase 1 -----------------------------------------------------------
    p1_cost = pl.CostEstimate(
        flops=2 * b_pad * dim * hp + 3 * b_pad * hp,
        transcendentals=0,
        bytes_accessed=(b_pad * dim * 2 + dim * hp * 2 + hp * 4
                        + b_pad * hp * 4 + 2 * grid_b * hp * 4),
    )
    h, psum, psq = pl.pallas_call(
        functools.partial(_phase1_kernel, batch=B, tile_b=tb, batch_padded=b_pad),
        grid=(grid_b,),
        in_specs=[
            pl.BlockSpec((tb, dim), lambda i: (i, 0)),    # x tile (bf16)
            resident((dim, hp)),                          # w1 (bf16, resident)
            resident((1, hp)),                            # b1 (f32, resident)
        ],
        out_specs=[
            pl.BlockSpec((tb, hp), lambda i: (i, 0)),     # h tile (f32)
            pl.BlockSpec((1, hp), lambda i: (i, 0)),      # per-tile sum(h)
            pl.BlockSpec((1, hp), lambda i: (i, 0)),      # per-tile sum(h*h)
        ],
        out_shape=(
            jax.ShapeDtypeStruct((b_pad, hp), jnp.float32),
            jax.ShapeDtypeStruct((grid_b, hp), jnp.float32),
            jax.ShapeDtypeStruct((grid_b, hp), jnp.float32),
        ),
        compiler_params=pltpu.CompilerParams(
            dimension_semantics=("parallel",),
            vmem_limit_bytes=_VMEM_LIMIT,
        ),
        cost_estimate=p1_cost,
    )(xb, p["w1"], p["b1"])

    # ---- BN finalize: O(hidden) work, plain JAX ----------------------------
    inv_n = 1.0 / jnp.float32(B)
    mean = jnp.sum(psum, axis=0, keepdims=True) * inv_n               # [1, hp]
    var = jnp.maximum(jnp.sum(psq, axis=0, keepdims=True) * inv_n
                      - mean * mean, 0.0)
    inv_std = jax.lax.rsqrt(var + BN_EPS)
    scale = p["gamma"] * inv_std                                      # [1, hp]
    shift = p["beta"] - mean * scale                                  # [1, hp]

    # ---- Phase 2 -----------------------------------------------------------
    p2_cost = pl.CostEstimate(
        flops=2 * b_pad * hp * pp + 3 * b_pad * hp,
        transcendentals=0,
        bytes_accessed=(b_pad * hp * 4 + 2 * hp * 4 + hp * pp * 2
                        + pp * 4 + b_pad * pp * 4),
    )
    out = pl.pallas_call(
        _phase2_kernel,
        grid=(grid_b,),
        in_specs=[
            pl.BlockSpec((tb, hp), lambda i: (i, 0)),     # h tile (f32)
            resident((1, hp)),                            # scale
            resident((1, hp)),                            # shift
            resident((hp, pp)),                           # w2 (bf16, resident)
            resident((1, pp)),                            # b2
        ],
        out_specs=pl.BlockSpec((tb, pp), lambda i: (i, 0)),
        out_shape=jax.ShapeDtypeStruct((b_pad, pp), jnp.float32),
        compiler_params=pltpu.CompilerParams(
            dimension_semantics=("parallel",),
            vmem_limit_bytes=_VMEM_LIMIT,
        ),
        cost_estimate=p2_cost,
    )(h, scale, shift, p["w2"], p["b2"])

    return out[:B, :proj]


# ---------------------------------------------------------------------------
# Parameter init + references
# ---------------------------------------------------------------------------
def init_params(key, dim, hidden, proj):
    """Mimics torch defaults: Linear U(±1/sqrt(fan_in)); BN gamma=1, beta=0.
    Linear weights are stored pre-transposed as [in, out]."""
    k1, k2, k3, k4 = jax.random.split(key, 4)
    bound1 = 1.0 / dim ** 0.5
    bound2 = 1.0 / hidden ** 0.5
    return {
        "w1": jax.random.uniform(k1, (dim, hidden), jnp.float32, -bound1, bound1),
        "b1": jax.random.uniform(k2, (1, hidden), jnp.float32, -bound1, bound1),
        "gamma": jnp.ones((1, hidden), jnp.float32),
        "beta": jnp.zeros((1, hidden), jnp.float32),
        "w2": jax.random.uniform(k3, (hidden, proj), jnp.float32, -bound2, bound2),
        "b2": jax.random.uniform(k4, (1, proj), jnp.float32, -bound2, bound2),
    }


def mlp_reference_f32(x, params):
    """Pure f32 reference matching the PyTorch module (training-mode BN)."""
    h = x @ params["w1"] + params["b1"]
    mean = jnp.mean(h, axis=0, keepdims=True)
    var = jnp.mean((h - mean) ** 2, axis=0, keepdims=True)
    h = (h - mean) / jnp.sqrt(var + BN_EPS)
    h = h * params["gamma"] + params["beta"]
    h = jnp.maximum(h, 0.0)
    return h @ params["w2"] + params["b2"]


def mlp_reference_bf16_matmul(x, params):
    """Same algorithm with bf16 matmul inputs / f32 accumulation, like the kernel."""
    h = jnp.dot(x.astype(jnp.bfloat16), params["w1"].astype(jnp.bfloat16),
                preferred_element_type=jnp.float32) + params["b1"]
    mean = jnp.mean(h, axis=0, keepdims=True)
    var = jnp.maximum(jnp.mean(h * h, axis=0, keepdims=True) - mean * mean, 0.0)
    scale = params["gamma"] * jax.lax.rsqrt(var + BN_EPS)
    shift = params["beta"] - mean * scale
    h = jnp.maximum(h * scale + shift, 0.0)
    return jnp.dot(h.astype(jnp.bfloat16), params["w2"].astype(jnp.bfloat16),
                   preferred_element_type=jnp.float32) + params["b2"]


if __name__ == "__main__":
    # Small shapes consistent with the module: dim=32, hidden=64, proj=16, batch=8.
    B, DIM, HIDDEN, PROJ = 8, 32, 64, 16

    key = jax.random.PRNGKey(0)
    kx, kp = jax.random.split(key)
    x = jax.random.normal(kx, (B, DIM), jnp.float32)
    params = init_params(kp, DIM, HIDDEN, PROJ)
    padded = prepare_params(params)   # pad/cast once, outside the hot path

    out = jax.block_until_ready(mlp_forward(x, padded))
    assert out.shape == (B, PROJ)

    ref_match = mlp_reference_bf16_matmul(x, params)   # same MXU precision
    ref_f32 = mlp_reference_f32(x, params)             # module semantics (f32)
    assert jnp.allclose(out, ref_match, atol=1e-4, rtol=1e-4), "mismatch (bf16-matched ref)"
    assert jnp.allclose(out, ref_f32, atol=5e-2, rtol=5e-2), "mismatch (f32 module ref)"

    print("KERNEL_OK")
</pallas_src>

<mosaic_0001>
module attributes {stable_mosaic.version = 11 : i64} {
  func.func @_phase1_kernel(%arg0: i32, %arg1: memref<8x32xbf16, #tpu.memory_space<vmem>>, %arg2: memref<32x128xbf16, #tpu.memory_space<vmem>>, %arg3: memref<1x128xf32, #tpu.memory_space<vmem>>, %arg4: memref<8x128xf32, #tpu.memory_space<vmem>>, %arg5: memref<1x128xf32, #tpu.memory_space<vmem>>, %arg6: memref<1x128xf32, #tpu.memory_space<vmem>>) attributes {dimension_semantics = [#tpu.dimension_semantics<parallel>], iteration_bounds = array<i64: 1>, scalar_prefetch = 0 : i64, scratch_operands = 0 : i64, tpu.core_type = #tpu.core_type<tc>, window_params = [{transform_indices = @transform_0, window_bounds = array<i64: 8, 32>}, {pipeline_mode = #tpu.pipeline_mode<synchronous>, transform_indices = @transform_1, window_bounds = array<i64: 32, 128>}, {pipeline_mode = #tpu.pipeline_mode<synchronous>, transform_indices = @transform_2, window_bounds = array<i64: 1, 128>}, {transform_indices = @transform_3, window_bounds = array<i64: 8, 128>}, {transform_indices = @transform_4, window_bounds = array<i64: 1, 128>}, {transform_indices = @transform_5, window_bounds = array<i64: 1, 128>}]} {
    %c0 = arith.constant 0 : index
    %c0_0 = arith.constant 0 : index
    %0 = vector.load %arg1[%c0, %c0_0] : memref<8x32xbf16, #tpu.memory_space<vmem>>, vector<8x32xbf16>
    %c0_1 = arith.constant 0 : index
    %c0_2 = arith.constant 0 : index
    %1 = vector.load %arg2[%c0_1, %c0_2] : memref<32x128xbf16, #tpu.memory_space<vmem>>, vector<32x128xbf16>
    %cst = arith.constant dense<0.000000e+00> : vector<8x128xf32>
    %2 = tpu.matmul %0, %1, %cst {dimension_numbers = #tpu.dot_dimension_numbers<[1], [0], [0], [1], [0, 0, 1, 1], [], []>} : vector<8x32xbf16>, vector<32x128xbf16>, vector<8x128xf32> -> vector<8x128xf32>
    %c0_3 = arith.constant 0 : index
    %c0_4 = arith.constant 0 : index
    %3 = vector.load %arg3[%c0_3, %c0_4] : memref<1x128xf32, #tpu.memory_space<vmem>>, vector<1x128xf32>
    %4 = vector.broadcast %3 : vector<1x128xf32> to vector<8x128xf32>
    %5 = arith.addf %2, %4 : vector<8x128xf32>
    %c0_5 = arith.constant 0 : index
    %c0_6 = arith.constant 0 : index
    %6 = vector.load %arg4[%c0_5, %c0_6] : memref<8x128xf32, #tpu.memory_space<vmem>>, vector<8x128xf32>
    tpu.vector_store %arg4[%c0_5, %c0_6], %5 {strides = array<i32>} : memref<8x128xf32, #tpu.memory_space<vmem>>, vector<8x128xf32>,
    %cst_7 = arith.constant dense<0.000000e+00> : vector<128xf32>
    %7 = vector.multi_reduction <add>, %5, %cst_7 [0] : vector<8x128xf32> to vector<128xf32>
    %8 = vector.shape_cast %7 : vector<128xf32> to vector<1x128xf32>
    %c0_8 = arith.constant 0 : index
    %c0_9 = arith.constant 0 : index
    %9 = vector.load %arg5[%c0_8, %c0_9] : memref<1x128xf32, #tpu.memory_space<vmem>>, vector<1x128xf32>
    tpu.vector_store %arg5[%c0_8, %c0_9], %8 {strides = array<i32>} : memref<1x128xf32, #tpu.memory_space<vmem>>, vector<1x128xf32>,
    %10 = arith.mulf %5, %5 : vector<8x128xf32>
    %cst_10 = arith.constant dense<0.000000e+00> : vector<128xf32>
    %11 = vector.multi_reduction <add>, %10, %cst_10 [0] : vector<8x128xf32> to vector<128xf32>
    %12 = vector.shape_cast %11 : vector<128xf32> to vector<1x128xf32>
    %c0_11 = arith.constant 0 : index
    %c0_12 = arith.constant 0 : index
    %13 = vector.load %arg6[%c0_11, %c0_12] : memref<1x128xf32, #tpu.memory_space<vmem>>, vector<1x128xf32>
    tpu.vector_store %arg6[%c0_11, %c0_12], %12 {strides = array<i32>} : memref<1x128xf32, #tpu.memory_space<vmem>>, vector<1x128xf32>,
    return
  }
  func.func @transform_0(%arg0: i32) -> (i32, i32) {
    %c0_i32 = arith.constant 0 : i32
    %c0_i32_0 = arith.constant 0 : i32
    return %arg0, %c0_i32 : i32, i32
  }
  func.func @transform_1(%arg0: i32) -> (i32, i32) {
    %c0_i32 = arith.constant 0 : i32
    %c0_i32_0 = arith.constant 0 : i32
    %c0_i32_1 = arith.constant 0 : i32
    return %c0_i32, %c0_i32_0 : i32, i32
  }
  func.func @transform_2(%arg0: i32) -> (i32, i32) {
    %c0_i32 = arith.constant 0 : i32
    %c0_i32_0 = arith.constant 0 : i32
    %c0_i32_1 = arith.constant 0 : i32
    return %c0_i32, %c0_i32_0 : i32, i32
  }
  func.func @transform_3(%arg0: i32) -> (i32, i32) {
    %c0_i32 = arith.constant 0 : i32
    %c0_i32_0 = arith.constant 0 : i32
    return %arg0, %c0_i32 : i32, i32
  }
  func.func @transform_4(%arg0: i32) -> (i32, i32) {
    %c0_i32 = arith.constant 0 : i32
    %c0_i32_0 = arith.constant 0 : i32
    return %arg0, %c0_i32 : i32, i32
  }
  func.func @transform_5(%arg0: i32) -> (i32, i32) {
    %c0_i32 = arith.constant 0 : i32
    %c0_i32_0 = arith.constant 0 : i32
    return %arg0, %c0_i32 : i32, i32
  }
}

</mosaic_0001>

<bundles_post_ra>
// kernel: tpu_custom_call.1
= control target key start
LH: loop header
LB: loop body
LE: loop exit
PB: predicated region body
PF: predicated region fallthrough
CT: control target
= control target key end

     0   :  { %11 = vsyncpa [#allocation3], 0  ;;  %s434_s0 = inlined_call_operand.hbm [shape: bf16[8,32], index: 0, kind: input, shape index: {}]   ;;  %s435_s1 = inlined_call_operand.hbm [shape: bf16[32,128], index: 1, kind: input, shape index: {}]   ;;  %s436_s2 = inlined_call_operand.vmem [shape: f32[1,128], index: 2, kind: input, shape index: {}]   ;;  %s437_s3 = inlined_call_operand.hbm [shape: f32[8,128], index: 3, kind: output, shape index: {0}]   ;;  %s438_s4 = inlined_call_operand.hbm [shape: f32[1,128], index: 4, kind: output, shape index: {1}]   ;;  %s439_s5 = inlined_call_operand.hbm [shape: f32[1,128], index: 5, kind: output, shape index: {2}]  }
   0x1   :  { %12 = vsyncpa [#allocation6], 0 }
   0x2   :  { %13 = vsyncpa [#allocation4], 0 }
   0x3   :  { %14 = vsyncpa [#allocation9], 0  ;;  %s317_s18 = smov [#allocation2]   ;;  %s318_s20 = smov [#allocation5]  }
   0x4   :  { %s21_s19 = sshll.u32 %s317_s18, 4  ;;  %s30_s21 = sshll.u32 %s318_s20, 4  ;;  %s22_s19 = int_to_ptr.vmem [resolvable:$true] %s21_s19  ;;  %s356_s21 = int_to_ptr.vmem [resolvable:$true] %s30_s21 }
   0x5   :  { %s199_s24 = scalar_lea.hbm %s434_s0, 64 }
   0x6   :  { %p200_p0 = scmp.ne.s32.totalorder %s434_s0, %s199_s24  ;;  %p203_p1 = scmp.lt.u32.totalorder %s199_s24, %s434_s0 }
   0x8   :  { %p205_p2 = pnand %p203_p1, %p200_p0 }
   0xa   :  { %208 = shalt.err (!%p205_p2)
}
   0xb   :  { %s209_s29 = scalar_lea.vmem %s22_s19, 64  ;;  %p214_p4 = scmp.lt.s32.totalorder %s22_s19, %s22_s19 }
   0xc   :  { %p210_p3 = scmp.ne.s32.totalorder %s22_s19, %s209_s29  ;;  %p215_p5 = scmp.lt.s32.totalorder %s209_s29, %s209_s29 }
   0xe   :  { %p216_p6 = por %p215_p5, %p214_p4 }
  0x10   :  { %p217_p7 = pnand %p216_p6, %p210_p3 }
  0x12   :  { %220 = shalt.err (!%p217_p7)
}
  0x13   :  { %24 = dma.hbm_to_vmem [thread:$0]  %s434_s0, 64, %s22_s19, [#allocation3]  }
  0x14   :  { %s221_s9 = scalar_lea.hbm %s435_s1, 256 }
  0x15   :  { %p222_p8 = scmp.ne.s32.totalorder %s435_s1, %s221_s9  ;;  %p225_p9 = scmp.lt.u32.totalorder %s221_s9, %s435_s1 }
  0x17   :  { %p227_p10 = pnand %p225_p9, %p222_p8 }
  0x19   :  { %230 = shalt.err (!%p227_p10)
}
  0x1a   :  { %s231_s14 = scalar_lea.vmem %s356_s21, 256  ;;  %p236_p12 = scmp.lt.s32.totalorder %s356_s21, %s356_s21 }
  0x1b   :  { %p232_p11 = scmp.ne.s32.totalorder %s356_s21, %s231_s14  ;;  %p237_p13 = scmp.lt.s32.totalorder %s231_s14, %s231_s14 }
  0x1d   :  { %p238_p0 = por %p237_p13, %p236_p12 }
  0x1f   :  { %p239_p1 = pnand %p238_p0, %p232_p11 }
  0x21   :  { %242 = shalt.err (!%p239_p1)
}
  0x22   :  { %s319_s0 = smov 64   ;;  %s320_s15 = smov 4  }
  0x23   :  { %36 = dma.hbm_to_vmem [thread:$0]  %s435_s1, 256, %s356_s21, [#allocation6], %s319_s0, %s319_s0, %s320_s15  }
  0x24   :  { %309 = dma.done.wait [#allocation3], 64  }
  0x25   :  { %310 = vsyncadd [#allocation3], 4294967232 }
  0x26   :  { %311 = dma.done.wait [#allocation6], 256  }
  0x27   :  { %312 = vsyncadd [#allocation6], 4294967040  ;;  %v321_v0 = vmov 0.0   ;;  %vm322_vm0 = vmmov 0   ;;  %v197_v1 = vld [vmem:[#allocation5] sm:$0xff]   ;;  %v198_v2 = vld [vmem:[#allocation5 + $0x8] sm:$0xff]  }
  0x28   :  { %180 = vmatprep.subr.bf16.mxu0 %v321_v0  ;;  %184 = vmatprep.mubr.msk.bf16.mxu0 %vm322_vm0, %v321_v0  ;;  %v46_v3 = vld [vmem:[#allocation2] sm:$0xf]  ;;  %vm70_vm1 = vcmask 261120   ;;  %s323_s1 = smov [#allocation7]  }
  0x29   :  { %181 = vmatpush3.bf16.msra.mxu0 %v197_v1  ;;  %v173_v4 = vld [vmem:[%s436_s2] ss:$0 sm:$0xff]  ;;  %s136_s20 = sshll.u32 %s323_s1, 4  ;;  %s137_s20 = int_to_ptr.vmem [resolvable:$true] %s136_s20 }
  0x2a   :  { %182 = vmatprep.subr.bf16.mxu0 %v321_v0  ;;  %s243_s21 = scalar_lea.vmem %s137_s20, 128  ;;  %p248_p3 = scmp.lt.s32.totalorder %s137_s20, %s137_s20 }
  0x2b   :  { %p244_p2 = scmp.ne.s32.totalorder %s137_s20, %s243_s21  ;;  %p249_p4 = scmp.lt.s32.totalorder %s243_s21, %s243_s21 }
  0x2d   :  { %183 = vmatpush3.bf16.msra.mxu0 %v198_v2  ;;  %p250_p5 = por %p249_p4, %p248_p3 }
  0x2f   :  { %p251_p6 = pnand %p250_p5, %p244_p2 }
  0x30   :  { %185 = vmatmul.mubr.msk.bf16.vlgmr.msra.gmra.mrb[0].mxu0 %vm70_vm1, %v46_v3 }
 0x103   :  { %v108_v5 = vpop.f32.mrb[0].mxu0 }
 0x104   :  { %v109_v6 = vadd.f32 %v173_v4, %v108_v5  ;;  %v186_v7 = vpop.f32.mrb[1].mxu0 }
 0x105   :  { %v111_v8 = vpop.f32.mrb[2].mxu0 }
 0x106   :  { %v115_v9 = vrot.slane %v109_v6, 4  ;;  %v122_v10 = vmul.f32 %v109_v6, %v109_v6  ;;  %114 = vst [vmem:[#allocation7] sm:$0xff] %v109_v6  ;;  %v187_v11 = vpop.f32.mrb[3].mxu0 }
 0x107   :  { %254 = shalt.err (!%p251_p6)
}
 0x108   :  { %s255_s23 = scalar_lea.hbm %s437_s3, 128 }
 0x109   :  { %p256_p7 = scmp.ne.s32.totalorder %s437_s3, %s255_s23  ;;  %p259_p8 = scmp.lt.u32.totalorder %s255_s23, %s437_s3 }
 0x10b   :  { %p261_p9 = pnand %p259_p8, %p256_p7 }
 0x10d   :  { %264 = shalt.err (!%p261_p9)
}
 0x10e   :  { %139 = dma.vmem_to_hbm [thread:$0]  %s137_s20, 128, %s437_s3, [#allocation4]   ;;  %v123_v12 = vrot.slane %v122_v10, 4  ;;  %v116_v13 = vadd.f32 %v115_v9, %v109_v6 }
 0x10f   :  { %s324_s30 = smov [#allocation8]   ;;  %s325_s7 = smov [#allocation10]  }
 0x110   :  { %v117_v14 = vrot.slane %v116_v13, 2  ;;  %v124_v15 = vadd.f32 %v123_v12, %v122_v10  ;;  %s146_s6 = sshll.u32 %s324_s30, 4  ;;  %s156_s8 = sshll.u32 %s325_s7, 4  ;;  %s147_s6 = int_to_ptr.vmem [resolvable:$true] %s146_s6  ;;  %s402_s8 = int_to_ptr.vmem [resolvable:$true] %s156_s8 }
 0x111   :  { %s265_s3 = scalar_lea.vmem %s147_s6, 16  ;;  %s269_s9 = scalar_lea.vmem %s147_s6, 32 }
 0x112   :  { %v118_v16 = vadd.f32 %v117_v14, %v116_v13  ;;  %v125_v17 = vrot.slane %v124_v15, 2  ;;  %p266_p10 = scmp.ne.s32.totalorder %s147_s6, %s265_s3  ;;  %p270_p11 = scmp.lt.s32.totalorder %s147_s6, %s147_s6 }
 0x113   :  { %p271_p12 = scmp.lt.s32.totalorder %s269_s9, %s265_s3 }
 0x114   :  { %v119_v18 = vrot.slane %v118_v16, 1  ;;  %v126_v19 = vadd.f32 %v125_v17, %v124_v15 }
 0x115   :  { %p272_p13 = por %p271_p12, %p270_p11 }
 0x116   :  { %v120_v20 = vadd.f32 %v119_v18, %v118_v16  ;;  %v127_v21 = vrot.slane %v126_v19, 1 }
 0x117   :  { %p273_p0 = pnand %p272_p13, %p266_p10 }
 0x118   :  { %121 = vst [vmem:[#allocation8] sm:$0x1] %v120_v20  ;;  %v128_v22 = vadd.f32 %v127_v21, %v126_v19 }
 0x119   :  { %276 = shalt.err (!%p273_p0)
}
 0x11a   :  { %s277_s12 = scalar_lea.hbm %s438_s4, 16 }
 0x11b   :  { %p278_p1 = scmp.ne.s32.totalorder %s438_s4, %s277_s12  ;;  %p281_p2 = scmp.lt.u32.totalorder %s277_s12, %s438_s4 }
 0x11d   :  { %p283_p3 = pnand %p281_p2, %p278_p1 }
 0x11f   :  { %286 = shalt.err (!%p283_p3)
}
 0x120   :  { %149 = dma.vmem_to_hbm [thread:$0]  %s147_s6, 16, %s438_s4, [#allocation9]   ;;  %129 = vst [vmem:[#allocation10] sm:$0x1] %v128_v22 }
 0x121   :  { %s287_s18 = scalar_lea.vmem %s402_s8, 16  ;;  %s291_s19 = scalar_lea.vmem %s402_s8, 32 }
 0x122   :  { %p288_p4 = scmp.ne.s32.totalorder %s402_s8, %s287_s18  ;;  %p292_p5 = scmp.lt.s32.totalorder %s402_s8, %s402_s8 }
 0x123   :  { %p293_p6 = scmp.lt.s32.totalorder %s291_s19, %s287_s18 }
 0x125   :  { %p294_p7 = por %p293_p6, %p292_p5 }
 0x127   :  { %p295_p8 = pnand %p294_p7, %p288_p4 }
 0x129   :  { %298 = shalt.err (!%p295_p8)
}
 0x12a   :  { %s299_s21 = scalar_lea.hbm %s439_s5, 16 }
 0x12b   :  { %p300_p9 = scmp.ne.s32.totalorder %s439_s5, %s299_s21  ;;  %p303_p10 = scmp.lt.u32.totalorder %s299_s21, %s439_s5 }
 0x12d   :  { %p305_p11 = pnand %p303_p10, %p300_p9 }
 0x12f   :  { %308 = shalt.err (!%p305_p11)
}
 0x130   :  { %159 = dma.vmem_to_hbm [thread:$0]  %s402_s8, 16, %s439_s5, [#allocation9]  }
 0x131   :  { %313 = dma.done.wait [#allocation4], 128  }
 0x132   :  { %314 = vsyncadd [#allocation4], 4294967168 }
 0x133   :  { %315 = dma.done.wait [#allocation9], 32  }
 0x134   :  { %316 = vsyncadd [#allocation9], 4294967264 }
 0x135   :  { %169 = vsyncpa [#allocation3], 1 }
 0x136   :  { %170 = vsyncpa [#allocation6], 1 }
 0x137   :  { %171 = vsyncpa [#allocation4], 1 }
 0x138   :  { %172 = vsyncpa [#allocation9], 1 }

</bundles_post_ra>
